<compile_context>
chip_gen: v6e
topology: v6e:2x2x1
jax: 0.10.0
libtpu: 0.0.40
codegen_flags: <defaults>
</compile_context>

<pallas_src>
import jax
import jax.numpy as jnp
from jax.experimental import pallas as pl
from jax.experimental.pallas import tpu as pltpu


# ----------------------------------------------------------------------------
# Helpers.
# ----------------------------------------------------------------------------
def _cdiv(a, b):
    return -(-a // b)


def _round_up(x, m):
    return _cdiv(x, m) * m


def _pick_tile(dim, max_tile, align):
    """Largest tile <= max_tile that splits `dim` into near-equal chunks,
    rounded up to `align` (minimizes edge padding)."""
    n_tiles = _cdiv(dim, max_tile)
    return _round_up(_cdiv(dim, n_tiles), align)


def _tile_config():
    """Per-TPU-generation (tm_max, tn_max, tk_max, vmem_limit_bytes)."""
    kind = ""
    try:
        kind = jax.devices()[0].device_kind.lower()
    except Exception:
        pass
    if "v5 lite" in kind or "v5e" in kind or "v5lite" in kind:
        # v5e: ~0.8 TB/s HBM, 128 MiB VMEM, 16 MiB scoped default -> raise it.
        return 512, 512, 512, 64 * 1024 * 1024
    if "v6" in kind:
        # v6e: 128 MiB VMEM; hold a large K slab resident to cut accumulator
        # passes and per-step overhead.
        return 512, 512, 2048, 96 * 1024 * 1024
    if "v7" in kind or "7x" in kind:
        # v7x: only 64 MiB physical VMEM per TC -> ~13 MiB working set.
        return 512, 512, 1024, 40 * 1024 * 1024
    # Unknown (v4 / v5p / interpret): safe middle ground.
    return 512, 512, 1024, 64 * 1024 * 1024


def _cost_estimate(B, M, N, K, itemsize):
    flops = 2 * B * M * N * K + 2 * B * M * N          # bmm + fused 2*a add
    bytes_accessed = (2 * B * M * N + B * M * K + B * K * N) * itemsize
    return pl.CostEstimate(flops=flops, transcendentals=0,
                           bytes_accessed=bytes_accessed)


# ----------------------------------------------------------------------------
# Small-problem path: one grid step per batch (parallel across batches).
# ----------------------------------------------------------------------------
def _baddbmm_batch_kernel(a_ref, b_ref, c_ref, o_ref):
    # All refs are 2-D (batch dim squeezed): a (M,N), b (M,K), c (K,N).
    acc = jnp.dot(b_ref[...], c_ref[...], preferred_element_type=jnp.float32)
    o_ref[...] = (acc + 2.0 * a_ref[...].astype(jnp.float32)).astype(o_ref.dtype)


def _baddbmm_small(a, b, c):
    B, M, N = a.shape
    K = b.shape[2]
    return pl.pallas_call(
        _baddbmm_batch_kernel,
        out_shape=jax.ShapeDtypeStruct((B, M, N), a.dtype),
        grid_spec=pltpu.PrefetchScalarGridSpec(
            num_scalar_prefetch=0,
            grid=(B,),
            in_specs=[
                pl.BlockSpec((pl.Squeezed(), M, N), lambda i: (i, 0, 0)),
                pl.BlockSpec((pl.Squeezed(), M, K), lambda i: (i, 0, 0)),
                pl.BlockSpec((pl.Squeezed(), K, N), lambda i: (i, 0, 0)),
            ],
            out_specs=pl.BlockSpec((pl.Squeezed(), M, N), lambda i: (i, 0, 0)),
        ),
        compiler_params=pltpu.CompilerParams(
            dimension_semantics=("parallel",),
        ),
        cost_estimate=_cost_estimate(B, M, N, K, jnp.dtype(a.dtype).itemsize),
    )(a, b, c)


# ----------------------------------------------------------------------------
# Tiled path: grid (B, M/tm, N/tn, K/tk), f32 VMEM accumulator initialized
# with the bias, pure cast+store finalize.
# ----------------------------------------------------------------------------
def _baddbmm_tiled_kernel(a_ref, b_ref, c_ref, o_ref, acc_ref):
    k = pl.program_id(3)

    @pl.when(k == 0)
    def _():
        # Fuse the bias into the accumulator init; `a`'s index_map is
        # k-independent so its tile is DMA'd once per (b, i, j) output tile.
        acc_ref[...] = 2.0 * a_ref[...].astype(jnp.float32)

    acc_ref[...] += jnp.dot(
        b_ref[...], c_ref[...], preferred_element_type=jnp.float32
    )

    @pl.when(k == pl.num_programs(3) - 1)
    def _():
        o_ref[...] = acc_ref[...].astype(o_ref.dtype)


def _baddbmm_tiled(a, b, c, *, tm, tn, tk, vmem_limit):
    B, M, N = a.shape
    K = b.shape[2]

    # Zero-pad to tile multiples; zero K-padding adds nothing to b@c and the
    # padded output rows/cols are sliced off afterwards.
    Mp, Np, Kp = _round_up(M, tm), _round_up(N, tn), _round_up(K, tk)
    if (Mp, Np) != (M, N):
        a = jnp.pad(a, ((0, 0), (0, Mp - M), (0, Np - N)))
    if (Mp, Kp) != (M, K):
        b = jnp.pad(b, ((0, 0), (0, Mp - M), (0, Kp - K)))
    if (Kp, Np) != (K, N):
        c = jnp.pad(c, ((0, 0), (0, Kp - K), (0, Np - N)))

    grid = (B, Mp // tm, Np // tn, Kp // tk)
    out = pl.pallas_call(
        _baddbmm_tiled_kernel,
        out_shape=jax.ShapeDtypeStruct((B, Mp, Np), a.dtype),
        grid_spec=pltpu.PrefetchScalarGridSpec(
            num_scalar_prefetch=0,
            grid=grid,
            in_specs=[
                # `a` index_map does not depend on k -> one DMA per output tile.
                pl.BlockSpec((pl.Squeezed(), tm, tn),
                             lambda bb, i, j, kk: (bb, i, j)),
                pl.BlockSpec((pl.Squeezed(), tm, tk),
                             lambda bb, i, j, kk: (bb, i, kk)),
                pl.BlockSpec((pl.Squeezed(), tk, tn),
                             lambda bb, i, j, kk: (bb, kk, j)),
            ],
            out_specs=pl.BlockSpec((pl.Squeezed(), tm, tn),
                                   lambda bb, i, j, kk: (bb, i, j)),
            scratch_shapes=[pltpu.VMEM((tm, tn), jnp.float32)],
        ),
        compiler_params=pltpu.CompilerParams(
            dimension_semantics=("parallel", "parallel", "parallel", "arbitrary"),
            vmem_limit_bytes=vmem_limit,
        ),
        cost_estimate=_cost_estimate(B, M, N, K, jnp.dtype(a.dtype).itemsize),
    )(a, b, c)

    if (Mp, Np) != (M, N):
        out = out[:, :M, :N]
    return out


# ----------------------------------------------------------------------------
# Public wrapper with dispatch.
# ----------------------------------------------------------------------------
def baddbmm_module(a, b, c):
    """Pallas implementation of SimpleBAddBmmModule.forward (alpha=beta=1)."""
    B, M, N = a.shape
    Bb, Mb, K = b.shape
    Bc, Kc, Nc = c.shape
    assert B == Bb == Bc, "batch mismatch"
    assert M == Mb, "M mismatch between a and b"
    assert K == Kc, "K mismatch between b and c"
    assert N == Nc, "N mismatch between a and c"

    itemsize = jnp.dtype(a.dtype).itemsize
    total_bytes = (a.size + b.size + c.size + B * M * N) * itemsize

    # Small path: working set well under 1 MiB -> per-batch full-tile grid
    # (batch-parallel, so both v7x TensorCores are used).
    if total_bytes <= (1 << 20):
        return _baddbmm_small(a, b, c)

    tm_max, tn_max, tk_max, vmem_limit = _tile_config()
    tm = _pick_tile(M, tm_max, 8)     # second-to-last dims: multiple of 8
    tn = _pick_tile(N, tn_max, 128)   # lane dims: multiple of 128
    tk = _pick_tile(K, tk_max, 128)   # last dim of b / sublane dim of c
    return _baddbmm_tiled(a, b, c, tm=tm, tn=tn, tk=tk, vmem_limit=vmem_limit)


def baddbmm_reference(a, b, c):
    return (a + a) + jnp.einsum(
        "bmk,bkn->bmn", b, c, preferred_element_type=jnp.float32
    ).astype(a.dtype)


if __name__ == "__main__":
    key = jax.random.PRNGKey(0)
    keys = jax.random.split(key, 9)

    # --- primary test: small shapes consistent with the module (small path) ---
    B, M, K, N = 2, 8, 32, 128
    a = jax.random.normal(keys[0], (B, M, N), dtype=jnp.float32)
    b = jax.random.normal(keys[1], (B, M, K), dtype=jnp.float32)
    c = jax.random.normal(keys[2], (B, K, N), dtype=jnp.float32)
    out = baddbmm_module(a, b, c)
    jax.block_until_ready(out)
    ref = baddbmm_reference(a, b, c)
    assert jnp.allclose(out, ref, atol=1e-4, rtol=1e-4), "small-path mismatch"

    # --- secondary test: exercise the tiled/accumulator path ---
    B2, M2, K2, N2 = 2, 256, 1024, 256
    a2 = jax.random.normal(keys[3], (B2, M2, N2), dtype=jnp.float32)
    b2 = jax.random.normal(keys[4], (B2, M2, K2), dtype=jnp.float32)
    c2 = jax.random.normal(keys[5], (B2, K2, N2), dtype=jnp.float32)
    out2 = baddbmm_module(a2, b2, c2)
    jax.block_until_ready(out2)
    ref2 = baddbmm_reference(a2, b2, c2)
    assert jnp.allclose(out2, ref2, atol=1e-3, rtol=1e-3), "tiled-path mismatch"

    # --- third test: non-tile-aligned shapes (padded tiled path) ---
    B3, M3, K3, N3 = 2, 200, 384, 200
    a3 = jax.random.normal(keys[6], (B3, M3, N3), dtype=jnp.float32)
    b3 = jax.random.normal(keys[7], (B3, M3, K3), dtype=jnp.float32)
    c3 = jax.random.normal(keys[8], (B3, K3, N3), dtype=jnp.float32)
    out3 = baddbmm_module(a3, b3, c3)
    jax.block_until_ready(out3)
    ref3 = baddbmm_reference(a3, b3, c3)
    assert out3.shape == (B3, M3, N3), "padded-path shape mismatch"
    assert jnp.allclose(out3, ref3, atol=1e-3, rtol=1e-3), "padded-path mismatch"

    print("KERNEL_OK")
</pallas_src>

<mosaic_0001>
module attributes {stable_mosaic.version = 11 : i64} {
  func.func @_baddbmm_batch_kernel(%arg0: i32, %arg1: memref<1x8x128xf32, #tpu.memory_space<vmem>>, %arg2: memref<1x8x32xf32, #tpu.memory_space<vmem>>, %arg3: memref<1x32x128xf32, #tpu.memory_space<vmem>>, %arg4: memref<1x8x128xf32, #tpu.memory_space<vmem>>) attributes {dimension_semantics = [#tpu.dimension_semantics<parallel>], iteration_bounds = array<i64: 2>, scalar_prefetch = 0 : i64, scratch_operands = 0 : i64, tpu.core_type = #tpu.core_type<tc>, window_params = [{transform_indices = @transform_0, window_bounds = array<i64: 1, 8, 128>}, {transform_indices = @transform_1, window_bounds = array<i64: 1, 8, 32>}, {transform_indices = @transform_2, window_bounds = array<i64: 1, 32, 128>}, {transform_indices = @transform_3, window_bounds = array<i64: 1, 8, 128>}]} {
    %c0 = arith.constant 0 : index
    %c0_0 = arith.constant 0 : index
    %c0_1 = arith.constant 0 : index
    %0 = vector.load %arg2[%c0, %c0_0, %c0_1] : memref<1x8x32xf32, #tpu.memory_space<vmem>>, vector<1x8x32xf32>
    %1 = vector.shape_cast %0 : vector<1x8x32xf32> to vector<8x32xf32>
    %c0_2 = arith.constant 0 : index
    %c0_3 = arith.constant 0 : index
    %c0_4 = arith.constant 0 : index
    %2 = vector.load %arg3[%c0_2, %c0_3, %c0_4] : memref<1x32x128xf32, #tpu.memory_space<vmem>>, vector<1x32x128xf32>
    %3 = vector.shape_cast %2 : vector<1x32x128xf32> to vector<32x128xf32>
    %cst = arith.constant dense<0.000000e+00> : vector<8x128xf32>
    %4 = tpu.matmul %1, %3, %cst {dimension_numbers = #tpu.dot_dimension_numbers<[1], [0], [0], [1], [0, 0, 1, 1], [], []>} : vector<8x32xf32>, vector<32x128xf32>, vector<8x128xf32> -> vector<8x128xf32>
    %c0_5 = arith.constant 0 : index
    %c0_6 = arith.constant 0 : index
    %c0_7 = arith.constant 0 : index
    %5 = vector.load %arg1[%c0_5, %c0_6, %c0_7] : memref<1x8x128xf32, #tpu.memory_space<vmem>>, vector<1x8x128xf32>
    %6 = vector.shape_cast %5 : vector<1x8x128xf32> to vector<8x128xf32>
    %cst_8 = arith.constant 2.000000e+00 : f32
    %7 = vector.broadcast %cst_8 : f32 to vector<8x128xf32>
    %8 = arith.mulf %7, %6 : vector<8x128xf32>
    %9 = arith.addf %4, %8 : vector<8x128xf32>
    %c0_9 = arith.constant 0 : index
    %c0_10 = arith.constant 0 : index
    %c0_11 = arith.constant 0 : index
    %10 = vector.load %arg4[%c0_9, %c0_10, %c0_11] : memref<1x8x128xf32, #tpu.memory_space<vmem>>, vector<1x8x128xf32>
    %11 = vector.shape_cast %10 : vector<1x8x128xf32> to vector<8x128xf32>
    %12 = vector.shape_cast %9 : vector<8x128xf32> to vector<1x8x128xf32>
    tpu.vector_store %arg4[%c0_9, %c0_10, %c0_11], %12 {strides = array<i32>} : memref<1x8x128xf32, #tpu.memory_space<vmem>>, vector<1x8x128xf32>,
    return
  }
  func.func @transform_0(%arg0: i32) -> (i32, i32, i32) {
    %c0_i32 = arith.constant 0 : i32
    %c0_i32_0 = arith.constant 0 : i32
    %c0_i32_1 = arith.constant 0 : i32
    return %arg0, %c0_i32, %c0_i32_0 : i32, i32, i32
  }
  func.func @transform_1(%arg0: i32) -> (i32, i32, i32) {
    %c0_i32 = arith.constant 0 : i32
    %c0_i32_0 = arith.constant 0 : i32
    %c0_i32_1 = arith.constant 0 : i32
    return %arg0, %c0_i32, %c0_i32_0 : i32, i32, i32
  }
  func.func @transform_2(%arg0: i32) -> (i32, i32, i32) {
    %c0_i32 = arith.constant 0 : i32
    %c0_i32_0 = arith.constant 0 : i32
    %c0_i32_1 = arith.constant 0 : i32
    return %arg0, %c0_i32, %c0_i32_0 : i32, i32, i32
  }
  func.func @transform_3(%arg0: i32) -> (i32, i32, i32) {
    %c0_i32 = arith.constant 0 : i32
    %c0_i32_0 = arith.constant 0 : i32
    %c0_i32_1 = arith.constant 0 : i32
    return %arg0, %c0_i32, %c0_i32_0 : i32, i32, i32
  }
}

</mosaic_0001>

<bundles_post_ra>
// kernel: tpu_custom_call.1
= control target key start
LH: loop header
LB: loop body
LE: loop exit
PB: predicated region body
PF: predicated region fallthrough
CT: control target
= control target key end

     0   :  { %s971_s0 = inlined_call_operand.hbm [shape: f32[2,8,128], index: 0, kind: input, shape index: {}]   ;;  %s972_s1 = inlined_call_operand.hbm [shape: f32[2,8,32], index: 1, kind: input, shape index: {}]   ;;  %s973_s2 = inlined_call_operand.hbm [shape: f32[2,32,128], index: 2, kind: input, shape index: {}]   ;;  %s974_s3 = inlined_call_operand.hbm [shape: f32[2,8,128], index: 3, kind: output, shape index: {}]  }
   0x1   :  { %979 = sst [smem:[#allocation13_spill]] %s972_s1 }
   0x2   :  { %8 = vsyncpa [#allocation3], 0 }
   0x3   :  { %10 = vsyncpa [#allocation3 + $0x1], 0 }
   0x4   :  { %11 = vsyncpa [#allocation6], 0 }
   0x5   :  { %13 = vsyncpa [#allocation6 + $0x1], 0 }
   0x6   :  { %14 = vsyncpa [#allocation4], 0 }
   0x7   :  { %16 = vsyncpa [#allocation4 + $0x1], 0  ;;  %s748_s12 = smov 0   ;;  %s750_s13 = smov 0  }
   0x8   :  { %s752_s14 = smov 0   ;;  %s754_s15 = smov 0  }
   0x9 LB: > { %s769_s16 = sadd.s32 4294967295, %s718_s15   ;;  %s469_s17 = sadd.s32 4294967294, %s718_s15   ;;  %s718_s15 = sphi %s754_s15, %s999_s15   ;;  %s714_s14 = sphi %s752_s14, %s998_s14   ;;  %s710_s13 = sphi %s750_s13, %s997_s13   ;;  %s706_s12 = sphi %s748_s12, %s996_s12  }
   0xa   : > { %s773_s18 = sadd.s32 1, %s718_s15   ;;  %s29_s19 = sadd.s32 1, %s714_s14 }
   0xb   : > { %s26_s20 = ssub.s32 %s718_s15, %s773_s18  ;;  %p36_p0 = scmp.ne.s32.totalorder %s714_s14, %s710_s13 }
   0xc   : > { %p27_p1 = scmp.eq.s32.totalorder %s26_s20, 0  ;;  %p37_p2 = scmp.eq.s32.totalorder %s718_s15, 0 }
   0xd   : > { %p42_p3 = scmp.ne.s32.totalorder %s710_s13, %s706_s12  ;;  %p43_p4 = scmp.eq.s32.totalorder %s769_s16, 0 }
   0xe   : > { %s785_s21 = scalar_select %p27_p1, %s714_s14, %s29_s19  }
   0xf   : > { %p38_p5 = por %p37_p2, %p36_p0  ;;  %p787_p6 = por %p43_p4, %p42_p3 }
  0x10   : > { %980 = sst [smem:[#allocation12_spill]] %s785_s21  ;;  %p118_p7 = scmp.eq.s32.totalorder %s769_s16, 1 }
  0x11   : > { %s981_s22 = scalar_select %p787_p6, 1, 0 }
  0x12   : > { %p124_p8 = scmp.eq.s32.totalorder %s469_s17, 1  ;;  %p528_p10 = scmp.lt.s32.totalorder %s718_s15, 2 }
  0x13   : > { %p794_p11 = por %p118_p7, %p36_p0  ;;  %s803_s25 = sand.u32 1, %s714_s14  }
  0x14   : > { %p798_p12 = por %p124_p8, %p42_p3  ;;  %s976_s26 = sshll.u32 %s718_s15, 7 }
  0x15   : > { %s982_s23 = scalar_select %p794_p11, 1, 0 }
  0x16   : > { %s983_s24 = scalar_select %p798_p12, 1, 0 }
  0x17   : > { %s975_s27 = sshll.u32 %s803_s25, 3  ;;  %p807_p13 = pnand %p528_p10, %p38_p5 }
  0x18   : > { %s162_s29 = sand.u32 1, %s718_s15   ;;  %s985_s1 = sld [smem:[#allocation13_spill]] }
  0x19   : > { %s166_s6 = scalar_lea.vmem [#allocation5], %s975_s27  ;;  %s476_s8 = sshll.u32 %s803_s25, 5 }
  0x1a   : > { %s173_s7 = sshll.u32 %s166_s6, 4  ;;  %s822_s9 = scalar_lea.sflag [#allocation6], %s162_s29  ;;  %s174_s7 = int_to_ptr.vmem [resolvable:$true] %s173_s7 }
  0x1b   : > { %p828_p1 = pneg %p807_p13 }
  0x1e   : > { %s817_s5 = scalar_lea.hbm %s985_s1, %s976_s26  ;;  %s571_s20 = scalar_lea.hbm %s985_s1, 256 }
  0x1f   : > { %s566_s10 = scalar_lea.hbm %s817_s5, 128  ;;  %p572_p4 = scmp.lt.s32.totalorder %s817_s5, %s985_s1 }
  0x20   : > { %p567_p0 = scmp.ne.s32.totalorder %s817_s5, %s566_s10  ;;  %p573_p5 = scmp.lt.s32.totalorder %s571_s20, %s566_s10 }
  0x22   : > { %p569_p2 = pnand %p828_p1, %p567_p0  ;;  %p574_p7 = por %p573_p5, %p572_p4 }
  0x24   : > { %p570_p3 = pneg %p569_p2 }
  0x26   : > { %p575_p8 = pnand %p574_p7, %p570_p3 }
  0x28   : > { %578 = shalt.err (!%p575_p8)
}
  0x29   : > { %s579_s29 = scalar_lea.vmem %s174_s7, 128  ;;  %s720_s6 = smov [#allocation5]  }
  0x2a   : > { %p580_p10 = scmp.ne.s32.totalorder %s174_s7, %s579_s29  ;;  %s584_s27 = sshll.u32 %s720_s6, 4  ;;  %s585_s27 = int_to_ptr.vmem [resolvable:$false] %s584_s27 }
  0x2b   : > { %s586_s26 = scalar_lea.vmem %s585_s27, 256  ;;  %p587_p0 = scmp.lt.s32.totalorder %s174_s7, %s585_s27 }
  0x2c   : > { %p582_p9 = pnand %p580_p10, %p828_p1  ;;  %p588_p2 = scmp.lt.s32.totalorder %s586_s26, %s579_s29 }
  0x2e   : > { %p583_p12 = pneg %p582_p9  ;;  %p589_p11 = por %p588_p2, %p587_p0 }
  0x30   : > { %p590_p6 = pnand %p589_p11, %p583_p12 }
  0x32   : > { %593 = shalt.err (!%p590_p6)
}
  0x33   : > { %520 = dma.hbm_to_vmem [thread:$0]  (!%p807_p13), %s817_s5, 128, %s174_s7, %s822_s9  }
  0x34   : > { %p479_p9 = scmp.ge.s32.totalorder %s718_s15, 1  ;;  %s184_s10 = scalar_lea.vmem [#allocation7], %s476_s8 }
  0x35   : > { %s191_s17 = sshll.u32 %s184_s10, 4  ;;  %p199_p3 = scmp.lt.s32.totalorder %s718_s15, 3  ;;  %s849_s17 = int_to_ptr.vmem [resolvable:$true] %s191_s17 }
  0x36   : > { %s988_s27 = sshll.u32 %s718_s15, 7  ;;  %s989_s4 = sshll.u32 %s803_s25, 3 }
  0x37   : > { %p851_p11 = pnand %p479_p9, %p199_p3  ;;  %s860_s30 = scalar_lea.hbm %s971_s0, %s988_s27 }
  0x38   : > { %s148_s5 = scalar_lea.vmem [#allocation2], %s989_s4  ;;  %s489_s8 = sshll.u32 %s718_s15, 9 }
  0x39   : > { %s987_s26 = scalar_select %p851_p11, 1, 0 }
  0x3a   : > { %s155_s7 = sshll.u32 %s148_s5, 4  ;;  %s145_s29 = scalar_lea.sflag [#allocation3], %s803_s25  ;;  %s156_s7 = int_to_ptr.vmem [resolvable:$true] %s155_s7 }
  0x3b   : > { %s594_s6 = scalar_lea.hbm %s860_s30, 128  ;;  %s599_s19 = scalar_lea.hbm %s971_s0, 256 }
  0x3c   : > { %p595_p6 = scmp.ne.s32.totalorder %s860_s30, %s594_s6  ;;  %p600_p5 = scmp.lt.s32.totalorder %s860_s30, %s971_s0 }
  0x3d   : > { %p601_p7 = scmp.lt.s32.totalorder %s599_s19, %s594_s6 }
  0x3e   : > { %p597_p12 = pnand %p595_p6, %p828_p1 }
  0x3f   : > { %p602_p8 = por %p601_p7, %p600_p5 }
  0x40   : > { %p598_p4 = pneg %p597_p12 }
  0x42   : > { %p603_p10 = pnand %p602_p8, %p598_p4 }
  0x44   : > { %606 = shalt.err (!%p603_p10)
}
  0x45   : > { %s607_s4 = scalar_lea.vmem %s156_s7, 128  ;;  %s721_s25 = smov [#allocation2]  }
  0x46   : > { %p608_p0 = scmp.ne.s32.totalorder %s156_s7, %s607_s4  ;;  %s612_s5 = sshll.u32 %s721_s25, 4  ;;  %s613_s5 = int_to_ptr.vmem [resolvable:$false] %s612_s5 }
  0x47   : > { %s614_s21 = scalar_lea.vmem %s613_s5, 256  ;;  %p615_p3 = scmp.lt.s32.totalorder %s156_s7, %s613_s5 }
  0x48   : > { %p610_p2 = pnand %p608_p0, %p828_p1  ;;  %p616_p6 = scmp.lt.s32.totalorder %s614_s21, %s607_s4 }
  0x4a   : > { %p611_p9 = pneg %p610_p2  ;;  %p617_p12 = por %p616_p6, %p615_p3 }
  0x4c   : > { %p618_p11 = pnand %p617_p12, %p611_p9 }
  0x4e   : > { %621 = shalt.err (!%p618_p11)
}
  0x4f   : > { %517 = dma.hbm_to_vmem [thread:$0]  (!%p807_p13), %s860_s30, 128, %s156_s7, %s145_s29  }
  0x50   : > { %s885_s10 = scalar_lea.hbm %s973_s2, %s489_s8  ;;  %s627_s20 = scalar_lea.hbm %s973_s2, 1024 }
  0x51   : > { %s622_s19 = scalar_lea.hbm %s885_s10, 512  ;;  %p628_p11 = scmp.lt.s32.totalorder %s885_s10, %s973_s2 }
  0x52   : > { %p623_p4 = scmp.ne.s32.totalorder %s885_s10, %s622_s19  ;;  %p629_p8 = scmp.lt.s32.totalorder %s627_s20, %s622_s19 }
  0x54   : > { %p625_p5 = pnand %p623_p4, %p828_p1  ;;  %p630_p10 = por %p629_p8, %p628_p11 }
  0x56   : > { %p626_p7 = pneg %p625_p5 }
  0x58   : > { %p631_p0 = pnand %p630_p10, %p626_p7 }
  0x5a   : > { %634 = shalt.err (!%p631_p0)
}
  0x5b   : > { %s635_s30 = scalar_lea.vmem %s849_s17, 512  ;;  %s722_s7 = smov [#allocation7]  }
  0x5c   : > { %p636_p2 = scmp.ne.s32.totalorder %s849_s17, %s635_s30  ;;  %s640_s8 = sshll.u32 %s722_s7, 4  ;;  %s641_s8 = int_to_ptr.vmem [resolvable:$false] %s640_s8 }
  0x5d   : > { %s642_s29 = scalar_lea.vmem %s641_s8, 1024  ;;  %p643_p6 = scmp.lt.s32.totalorder %s849_s17, %s641_s8 }
  0x5e   : > { %p638_p9 = pnand %p636_p2, %p828_p1  ;;  %p644_p12 = scmp.lt.s32.totalorder %s642_s29, %s635_s30 }
  0x60   : > { %p639_p3 = pneg %p638_p9  ;;  %p645_p4 = por %p644_p12, %p643_p6 }
  0x62   : > { %p646_p5 = pnand %p645_p4, %p639_p3 }
  0x64   : > { %649 = shalt.err (!%p646_p5)
}
  0x65   : > { %s723_s5 = smov 128   ;;  %s724_s1 = smov 8  }
  0x66   : > { %523 = dma.hbm_to_vmem [thread:$0]  (!%p807_p13), %s885_s10, 512, %s849_s17, %s822_s9, %s723_s5, %s723_s5, %s724_s1  }
  0x67   : > { %p990_p1 = scmp.ne.s32.totalorder %s987_s26, 0 }
  0x68   : > { %s911_s11 = sand.u32 (!%p990_p1), 1, %s710_s13   ;;  %p991_p7 = scmp.ne.s32.totalorder (!%p990_p1), %s981_s22, 0 }
  0x69   : > { %203 = sbr.rel (%p990_p1) target bundleno = 332 (0x14c), region = 32  ;;  %s914_s6 = sshll.u32 (!%p990_p1), %s911_s11, 3 }
  0x6a   : > { %s206_s19 = scalar_lea.sflag (!%p990_p1), [#allocation3], %s911_s11  ;;  %s209_s21 = scalar_lea.vmem (!%p990_p1), [#allocation2], %s914_s6 }
  0x6e   : > { %693 = dma.done.wait (%p991_p7), %s206_s19, 128  }
  0x6f   : > { %695 = vsyncadd (%p991_p7), %s206_s19, 4294967168  ;;  %s214_s28 = sand.u32 1, %s769_s16   ;;  %s218_s17 = scalar_lea.vmem [#allocation5], %s914_s6 }
  0x70   : > { %s215_s9 = scalar_lea.sflag [#allocation6], %s214_s28 }
  0x71   : > { %697 = dma.done.wait (%p991_p7), %s215_s9, 640  }
  0x72   : > { %699 = vsyncadd (%p991_p7), %s215_s9, 4294966656  ;;  %v725_v0 = vmov 0.0   ;;  %s482_s26 = sshll.u32 %s911_s11, 5  ;;  %vm726_vm0 = vmmov 0   ;;  %v260_v5 = vld [vmem:[%s218_s17] sm:$0xff]  ;;  %vm267_vm1 = vcmask 261120  }
  0x73   : > { %495 = vmatprep.subr.mxu0 %v725_v0  ;;  %503 = vmatprep.mubr.msk.f32.mxu0 %vm726_vm0, %v725_v0  ;;  %s227_s10 = scalar_lea.vmem [#allocation7], %s482_s26  ;;  %v265_v6 = vld [vmem:[%s209_s21] sm:$0xff]  ;;  %s486_s22 = sshll.u32 %s769_s16, 7 }
  0x74   : > { %v264_v1 = vld [vmem:[%s227_s10 + $0x18] sm:$0xff]  ;;  %v263_v2 = vld [vmem:[%s227_s10 + $0x10] sm:$0xff]  ;;  %v262_v3 = vld [vmem:[%s227_s10 + $0x8] sm:$0xff]  ;;  %v266_v7 = vmul.f32 2.0, %v265_v6  ;;  %s259_s27 = scalar_lea.vmem [#allocation8], %s914_s6  ;;  %s934_s30 = scalar_lea.hbm %s974_s3, %s486_s22 }
  0x75   : > { %496 = vmatpush3.msra.mxu0 %v264_v1  ;;  %v261_v4 = vld [vmem:[%s227_s10] sm:$0xff]  ;;  %s356_s20 = sshll.u32 %s259_s27, 4  ;;  %s343_s7 = scalar_lea.sflag [#allocation4], %s911_s11  ;;  %s357_s20 = int_to_ptr.vmem [resolvable:$true] %s356_s20 }
  0x76   : > { %497 = vmatprep.subr.mxu0 %v725_v0  ;;  %s650_s8 = scalar_lea.vmem %s357_s20, 128  ;;  %p992_p11 = scmp.ne.s32.totalorder %s982_s23, 0 }
  0x77   : > { %498 = vmatpush3.msra.mxu0 %v263_v2  ;;  %p651_p13 = scmp.ne.s32.totalorder %s357_s20, %s650_s8  ;;  %s727_s29 = smov [#allocation8]  }
  0x78   : > { %499 = vmatprep.subr.mxu0 %v725_v0  ;;  %s654_s16 = sshll.u32 %s727_s29, 4  ;;  %s655_s16 = int_to_ptr.vmem [resolvable:$false] %s654_s16 }
  0x79   : > { %500 = vmatpush3.msra.mxu0 %v262_v3  ;;  %p652_p8 = pnand %p651_p13, %p992_p11  ;;  %s656_s5 = scalar_lea.vmem %s655_s16, 256 }
  0x7a   : > { %501 = vmatprep.subr.mxu0 %v725_v0  ;;  %p657_p0 = scmp.lt.s32.totalorder %s357_s20, %s655_s16  ;;  %p658_p2 = scmp.lt.s32.totalorder %s656_s5, %s650_s8 }
  0x7b   : > { %502 = vmatpush3.msra.mxu0 %v261_v4  ;;  %p653_p10 = pneg %p652_p8 }
  0x7c   : > { %504 = vmatmul.mubr.msk.f32.vlgmr.msra.gmra.mxu0 %vm267_vm1, %v260_v5  ;;  %p659_p9 = por %p658_p2, %p657_p0 }
  0x7e   : > { %p660_p3 = pnand %p659_p9, %p653_p10 }
 0x13c   : > { %v337_v8 = vpop.f32.mrf.mxu0 }
 0x13d   : > { %v338_v9 = vadd.f32 %v337_v8, %v266_v7 }
 0x13e   : > { %v505_v10 = vpop.f32.mrf.mxu0 }
 0x13f   : > { %341 = vst [vmem:[%s259_s27] sm:$0xff] %v338_v9 }
 0x140   : > { %663 = shalt.err (!%p660_p3)
}
 0x141   : > { %s664_s1 = scalar_lea.hbm %s934_s30, 128  ;;  %s668_s19 = scalar_lea.hbm %s974_s3, 256 }
 0x142   : > { %p665_p6 = scmp.ne.s32.totalorder %s934_s30, %s664_s1  ;;  %p669_p5 = scmp.lt.s32.totalorder %s934_s30, %s974_s3 }
 0x143   : > { %p670_p1 = scmp.lt.s32.totalorder %s668_s19, %s664_s1 }
 0x144   : > { %p666_p12 = pnand %p665_p6, %p992_p11 }
 0x145   : > { %p671_p7 = por %p670_p1, %p669_p5 }
 0x146   : > { %p667_p4 = pneg %p666_p12 }
 0x148   : > { %p672_p13 = pnand %p671_p7, %p667_p4 }
 0x14a   : > { %675 = shalt.err (!%p672_p13)
}
 0x14b   : > { %512 = dma.vmem_to_hbm [thread:$0]  (%p992_p11), %s357_s20, 128, %s934_s30, %s343_s7  }
 0x14c PF: > { %s368_s9 = sand.u32 1, %s706_s12   ;;  %p993_p8 = scmp.ne.s32.totalorder %s983_s24, 0 }
 0x14d   : > { %p994_p10 = scmp.ge.s32.totalorder %s718_s15, 2  ;;  %s369_s17 = scalar_lea.sflag [#allocation4], %s368_s9 }
 0x14f   : > { %p525_p0 = pnand %p994_p10, %p993_p8 }
 0x151   : > { %p526_p2 = pneg %p525_p0 }
 0x153   : > { %701 = dma.done.wait (%p526_p2), %s369_s17, 128  }
 0x154   : > { %703 = vsyncadd (%p526_p2), %s369_s17, 4294967168  ;;  %s995_s26 = sld [smem:[#allocation12_spill]]  ;;  %p19_p9 = scmp.ge.s32.totalorder %s773_s18, 4  }
 0x155   : > { %s996_s12 = smov %s710_s13  ;;  %s997_s13 = smov %s714_s14 }
 0x156   : > { %s999_s15 = smov %s773_s18  ;;  %21 = sbr.rel (!%p19_p9) target bundleno = 9 (0x9), region = 101 }
 0x15a   : > { %s998_s14 = smov %s995_s26 }
 0x15b   :  { %374 = vsyncpa [#allocation3], 1 }
 0x15c   :  { %376 = vsyncpa [#allocation3 + $0x1], 1 }
 0x15d   :  { %377 = vsyncpa [#allocation6], 1 }
 0x15e   :  { %379 = vsyncpa [#allocation6 + $0x1], 1 }
 0x15f   :  { %380 = vsyncpa [#allocation4], 1 }
 0x160   :  { %382 = vsyncpa [#allocation4 + $0x1], 1 }

</bundles_post_ra>
